<compile_context>
chip_gen: v6e
topology: v6e:2x2x1
jax: 0.10.0
libtpu: 0.0.40
codegen_flags: <defaults>
</compile_context>

<pallas_src>
import functools

import jax
import jax.numpy as jnp
from jax import lax
from jax.experimental import pallas as pl
from jax.experimental.pallas import tpu as pltpu

N_BINS = 15
_MAX_TILE = 65536                       # absolute cap on the lane tile
_VMEM_BUDGET = 24 * 1024 * 1024         # per-kernel working-set target (fits v7x 32 MiB scoped)

# Contract the last dim of both operands (A @ B^T) -- flash-attention q@k^T pattern.
_TRANS_B_DIMS = (((1,), (1,)), ((), ()))


def _round_up(x, m):
    return ((x + m - 1) // m) * m


def _pow2_tile(cap):
    """Largest 128 * 2^k lane tile that is <= cap (at least 128)."""
    t = 128
    while t * 2 <= cap:
        t *= 2
    return t


def _conf_acc_kernel(logits_ref, labels_ref, conf_ref, acc_ref, *, n, tile):
    """Per-sample max softmax probability (confidence) and argmax == label (accuracy).

    logits_ref: (Cp, TN) f32  -- classes on sublanes, samples on lanes
    labels_ref: (1, TN) i32
    conf_ref / acc_ref: (1, TN) f32 lane-dense outputs.  Columns >= n (padding) get the
    sentinel conf = 2.0 (falls in no bin downstream) and acc = 0.
    """
    x = logits_ref[...]                                        # (Cp, TN)
    col_max = jnp.max(x, axis=0, keepdims=True)                # (1, TN) sublane reduce
    denom = jnp.sum(jnp.exp(x - col_max), axis=0, keepdims=True)
    # Max softmax prob == exp(x_max - x_max) / denom == 1 / denom (not a bug).
    conf = pl.reciprocal(denom)                                # exact; conf feeds bin edges
    cls = lax.broadcasted_iota(jnp.int32, x.shape, 0)
    # First class index attaining the max (matches documented torch.max tie-breaking).
    pred = jnp.min(jnp.where(x == col_max, cls, jnp.int32(x.shape[0])),
                   axis=0, keepdims=True)                      # (1, TN)
    hit = pred == labels_ref[...]
    # Mask the padded tail columns (n is a static Python int closed over at trace time).
    col = pl.program_id(0) * tile + lax.broadcasted_iota(jnp.int32, conf.shape, 1)
    valid = col < n
    conf_ref[...] = jnp.where(valid, conf, jnp.float32(2.0))
    acc_ref[...] = jnp.logical_and(valid, hit).astype(jnp.float32)


def _bin_sums_kernel(conf_ref, acc_ref, edges_ref, sums_ref):
    """Cumulative "conf > edge" sums of [conf, acc, 1], accumulated over grid axis 1.

    conf_ref / acc_ref: (1, TN) f32
    edges_ref:          (NBE, 1) f32 (n_bins+1 real edges first; padded rows unused)
    sums_ref:           (NBE, 3) f32 accumulator, resident across the reduction axis.
    """
    @pl.when(pl.program_id(1) == 0)
    def _init():
        sums_ref[...] = jnp.zeros_like(sums_ref)

    conf = conf_ref[...]                                       # (1, TN)
    acc = acc_ref[...]                                         # (1, TN)
    # One-sided step mask: 1 compare + 1 cast per (edge, sample); half the VALU work of
    # the two-sided (lo < conf <= up) test.  Sentinel conf = 2.0 rows are all-ones and
    # cancel exactly in the adjacent-row differences taken in the epilogue.
    ge = (conf > edges_ref[...]).astype(jnp.float32)           # (NBE, TN)
    # Fused RHS [conf; acc; ones] via sublane-broadcast selects (no concatenate needed):
    # one MXU pass then yields sum(conf), sum(acc) and count for every edge.
    row = lax.broadcasted_iota(jnp.int32, (3, conf.shape[1]), 0)
    rhs = jnp.where(row == 0, conf,
                    jnp.where(row == 1, acc, jnp.float32(1.0)))  # (3, TN)
    sums_ref[...] += lax.dot_general(ge, rhs, _TRANS_B_DIMS,
                                     preferred_element_type=jnp.float32)


def adaptive_ece(logits, labels, n_bins=N_BINS, *, class_major=False,
                 max_tile=_MAX_TILE, vmem_budget=_VMEM_BUDGET):
    """Adaptive (equal-count-bin) expected calibration error. Returns a (1,) f32 array."""
    if class_major:
        logits_t = jnp.asarray(logits, jnp.float32)            # already (C, N)
        c, n = logits_t.shape
    else:
        x = jnp.asarray(logits, jnp.float32)
        n, c = x.shape
        # Class dim -> sublanes, sample dim -> lanes.  With small C a native (TN, C)
        # block pads lanes 8-16x in VMEM, so one XLA transpose up front is cheaper and
        # keeps the conf/acc intermediates lane-dense for kernel 2.
        logits_t = x.T                                         # (C, N)
    labels2d = jnp.asarray(labels, jnp.int32).reshape(1, n)

    c_pad = _round_up(c, 8)
    nbe = _round_up(n_bins + 1, 8)

    # Lane tiles: 128 * 2^k, bounded by a VMEM byte budget (8x sublane padding of (1, TN)
    # blocks + in-kernel temps included) and by N so small inputs are not over-padded.
    per_col_k1 = 16 * c_pad + 192          # logits (dbl-buf) + exp temps + labels + conf/acc
    per_col_k2 = 64 + 64 + 8 * nbe + 32    # conf + acc (dbl-buf) + ge temps + rhs temp
    tn1 = _pow2_tile(min(max_tile, vmem_budget // per_col_k1, max(n // 4, 128)))
    tn2 = _pow2_tile(min(max_tile, vmem_budget // per_col_k2, max(n // 8, 128)))
    n_pad = _round_up(n, max(tn1, 2 * tn2))

    # Pad classes to a sublane multiple and samples to the tile granularity.  -1e30 keeps
    # padded classes out of the max/argmax and contributes exp() == 0 to the denominator.
    logits_t = jnp.pad(logits_t, ((0, c_pad - c), (0, n_pad - n)),
                       constant_values=-1e30)
    labels2d = jnp.pad(labels2d, ((0, 0), (0, n_pad - n)))

    # Kernel 1: softmax confidence + accuracy, tiled over N, lane-dense (1, N) outputs
    # emitted in exactly the layout kernel 2 consumes.
    conf, acc = pl.pallas_call(
        functools.partial(_conf_acc_kernel, n=n, tile=tn1),
        grid=(n_pad // tn1,),
        in_specs=[
            pl.BlockSpec((c_pad, tn1), lambda i: (0, i)),
            pl.BlockSpec((1, tn1), lambda i: (0, i)),
        ],
        out_specs=(
            pl.BlockSpec((1, tn1), lambda i: (0, i)),
            pl.BlockSpec((1, tn1), lambda i: (0, i)),
        ),
        out_shape=(
            jax.ShapeDtypeStruct((1, n_pad), jnp.float32),
            jax.ShapeDtypeStruct((1, n_pad), jnp.float32),
        ),
        compiler_params=pltpu.CompilerParams(
            dimension_semantics=("parallel",),          # megacore-shardable on v7x
            vmem_limit_bytes=32 * 1024 * 1024,
        ),
    )(logits_t, labels2d)

    # Adaptive equal-count bin edges (histedges_equalN) -- plain JAX glue on the n valid
    # samples only.
    # TODO(synk): the full sort has no clean single-kernel Pallas equivalent; kept in JAX.
    sorted_conf = jnp.sort(conf[0, :n])
    edges = jnp.interp(
        jnp.linspace(0.0, float(n), n_bins + 1),
        jnp.arange(n, dtype=jnp.float32),
        sorted_conf,
    ).astype(jnp.float32)
    edges_col = jnp.concatenate(
        [edges, jnp.full((nbe - (n_bins + 1),), 2.0, jnp.float32)]).reshape(nbe, 1)

    # Kernel 2: cumulative per-edge sums on the MXU.  Leading size-2 "parallel" axis
    # splits the sample range across v7x's two TensorCores; the trailing axis carries the
    # per-half accumulators (a reduction) so it must stay "arbitrary".
    steps = n_pad // (2 * tn2)
    sums = pl.pallas_call(
        _bin_sums_kernel,
        grid=(2, steps),
        in_specs=[
            pl.BlockSpec((1, tn2), lambda p, i: (0, p * steps + i)),
            pl.BlockSpec((1, tn2), lambda p, i: (0, p * steps + i)),
            pl.BlockSpec((nbe, 1), lambda p, i: (0, 0)),
        ],
        out_specs=pl.BlockSpec((nbe, 3), lambda p, i: (p, 0)),
        out_shape=jax.ShapeDtypeStruct((2 * nbe, 3), jnp.float32),
        compiler_params=pltpu.CompilerParams(
            dimension_semantics=("parallel", "arbitrary"),
            vmem_limit_bytes=32 * 1024 * 1024,
        ),
    )(conf, acc, edges_col)

    # Tiny epilogue in plain JAX: combine the two halves, difference adjacent edges, and
    # reduce the n_bins per-bin |avg_conf - avg_acc| * prop terms.
    cum = sums.reshape(2, nbe, 3).sum(axis=0)[: n_bins + 1]    # (n_bins+1, 3) cumulative
    per_bin = cum[:-1] - cum[1:]                               # (n_bins, 3): conf, acc, count
    csum, asum, cnt = per_bin[:, 0], per_bin[:, 1], per_bin[:, 2]
    safe = jnp.maximum(cnt, 1.0)
    contrib = jnp.where(
        cnt > 0.0,
        jnp.abs(csum / safe - asum / safe) * (cnt / jnp.float32(n)),
        0.0,
    )
    return jnp.sum(contrib).reshape(1)  # matches torch.zeros(1)-shaped output


def _reference_adaptive_ece(logits, labels, n_bins=N_BINS):
    """Pure-JAX mirror of the torch AdaptiveECELoss forward (validation only)."""
    probs = jax.nn.softmax(logits.astype(jnp.float32), axis=1)
    conf = jnp.max(probs, axis=1)
    pred = jnp.argmax(probs, axis=1)
    acc = (pred == labels).astype(jnp.float32)
    n = conf.shape[0]
    edges = jnp.interp(jnp.linspace(0.0, float(n), n_bins + 1),
                       jnp.arange(n, dtype=jnp.float32), jnp.sort(conf))
    ece = jnp.float32(0.0)
    for b in range(n_bins):
        in_bin = jnp.logical_and(conf > edges[b], conf <= edges[b + 1])
        cnt = jnp.sum(in_bin.astype(jnp.float32))
        safe = jnp.maximum(cnt, 1.0)
        avg_c = jnp.sum(jnp.where(in_bin, conf, 0.0)) / safe
        avg_a = jnp.sum(jnp.where(in_bin, acc, 0.0)) / safe
        ece = ece + jnp.where(cnt > 0.0, jnp.abs(avg_c - avg_a) * (cnt / n), 0.0)
    return ece


if __name__ == "__main__":
    key = jax.random.PRNGKey(0)
    k1, k2, k3, k4 = jax.random.split(key, 4)

    # Main case: N a multiple of 128 (no tail padding), small C.
    N, C = 2048, 16
    logits = jax.random.normal(k1, (N, C), dtype=jnp.float32) * 2.0
    labels = jax.random.randint(k2, (N,), 0, C, dtype=jnp.int32)
    ece = adaptive_ece(logits, labels)
    jax.block_until_ready(ece)
    assert ece.shape == (1,)
    ref = _reference_adaptive_ece(logits, labels)
    assert jnp.allclose(ece[0], ref, atol=2e-3), (float(ece[0]), float(ref))

    # Robustness case: N not a multiple of 128 and C not a multiple of 8
    # (exercises sample padding + in-kernel tail masking and class padding).
    N2, C2 = 777, 10
    logits2 = jax.random.normal(k3, (N2, C2), dtype=jnp.float32) * 2.0
    labels2 = jax.random.randint(k4, (N2,), 0, C2, dtype=jnp.int32)
    ece2 = adaptive_ece(logits2, labels2)
    jax.block_until_ready(ece2)
    ref2 = _reference_adaptive_ece(logits2, labels2)
    assert jnp.allclose(ece2[0], ref2, atol=5e-3), (float(ece2[0]), float(ref2))

    print("KERNEL_OK")
</pallas_src>

<mosaic_0001>
module attributes {stable_mosaic.version = 11 : i64} {
  func.func @_conf_acc_kernel(%arg0: i32, %arg1: memref<16x512xf32, #tpu.memory_space<vmem>>, %arg2: memref<1x512xi32, #tpu.memory_space<vmem>>, %arg3: memref<1x512xf32, #tpu.memory_space<vmem>>, %arg4: memref<1x512xf32, #tpu.memory_space<vmem>>) attributes {dimension_semantics = [#tpu.dimension_semantics<parallel>], iteration_bounds = array<i64: 4>, scalar_prefetch = 0 : i64, scratch_operands = 0 : i64, tpu.core_type = #tpu.core_type<tc>, window_params = [{transform_indices = @transform_0, window_bounds = array<i64: 16, 512>}, {transform_indices = @transform_1, window_bounds = array<i64: 1, 512>}, {transform_indices = @transform_2, window_bounds = array<i64: 1, 512>}, {transform_indices = @transform_3, window_bounds = array<i64: 1, 512>}]} {
    %c0 = arith.constant 0 : index
    %c0_0 = arith.constant 0 : index
    %0 = vector.load %arg1[%c0, %c0_0] : memref<16x512xf32, #tpu.memory_space<vmem>>, vector<16x512xf32>
    %cst = arith.constant dense<0xFF800000> : vector<512xf32>
    %1 = vector.multi_reduction <maximumf>, %0, %cst [0] : vector<16x512xf32> to vector<512xf32>
    %2 = vector.shape_cast %1 : vector<512xf32> to vector<1x512xf32>
    %3 = vector.broadcast %2 : vector<1x512xf32> to vector<16x512xf32>
    %4 = arith.subf %0, %3 : vector<16x512xf32>
    %5 = math.exp %4 : vector<16x512xf32>
    %cst_1 = arith.constant dense<0.000000e+00> : vector<512xf32>
    %6 = vector.multi_reduction <add>, %5, %cst_1 [0] : vector<16x512xf32> to vector<512xf32>
    %7 = vector.shape_cast %6 : vector<512xf32> to vector<1x512xf32>
    %8 = tpu.reciprocal %7 : vector<1x512xf32> -> vector<1x512xf32>
    %9 = tpu.iota {dimensions = array<i32: 0>} : vector<16x512xi32>
    %10 = vector.broadcast %2 : vector<1x512xf32> to vector<16x512xf32>
    %11 = arith.cmpf oeq, %0, %10 : vector<16x512xf32>
    %c16_i32 = arith.constant 16 : i32
    %12 = vector.broadcast %c16_i32 : i32 to vector<16x512xi32>
    %13 = arith.select %11, %9, %12 : vector<16x512xi1>, vector<16x512xi32>
    %cst_2 = arith.constant dense<2147483647> : vector<512xi32>
    %14 = vector.multi_reduction <minsi>, %13, %cst_2 [0] : vector<16x512xi32> to vector<512xi32>
    %15 = vector.shape_cast %14 : vector<512xi32> to vector<1x512xi32>
    %c0_3 = arith.constant 0 : index
    %c0_4 = arith.constant 0 : index
    %16 = vector.load %arg2[%c0_3, %c0_4] : memref<1x512xi32, #tpu.memory_space<vmem>>, vector<1x512xi32>
    %17 = arith.cmpi eq, %15, %16 : vector<1x512xi32>
    %c512_i32 = arith.constant 512 : i32
    %18 = arith.muli %arg0, %c512_i32 : i32
    %19 = tpu.iota {dimensions = array<i32: 1>} : vector<1x512xi32>
    %20 = vector.broadcast %18 : i32 to vector<1x512xi32>
    %21 = arith.addi %20, %19 : vector<1x512xi32>
    %c2048_i32 = arith.constant 2048 : i32
    %22 = vector.broadcast %c2048_i32 : i32 to vector<1x512xi32>
    %23 = arith.cmpi slt, %21, %22 : vector<1x512xi32>
    %cst_5 = arith.constant 2.000000e+00 : f32
    %24 = vector.broadcast %cst_5 : f32 to vector<1x512xf32>
    %25 = arith.select %23, %8, %24 : vector<1x512xi1>, vector<1x512xf32>
    %c0_6 = arith.constant 0 : index
    %c0_7 = arith.constant 0 : index
    %26 = vector.load %arg3[%c0_6, %c0_7] : memref<1x512xf32, #tpu.memory_space<vmem>>, vector<1x512xf32>
    tpu.vector_store %arg3[%c0_6, %c0_7], %25 {strides = array<i32>} : memref<1x512xf32, #tpu.memory_space<vmem>>, vector<1x512xf32>,
    %27 = arith.andi %23, %17 : vector<1x512xi1>
    %28 = arith.extui %27 : vector<1x512xi1> to vector<1x512xi32>
    %29 = arith.sitofp %28 : vector<1x512xi32> to vector<1x512xf32>
    %c0_8 = arith.constant 0 : index
    %c0_9 = arith.constant 0 : index
    %30 = vector.load %arg4[%c0_8, %c0_9] : memref<1x512xf32, #tpu.memory_space<vmem>>, vector<1x512xf32>
    tpu.vector_store %arg4[%c0_8, %c0_9], %29 {strides = array<i32>} : memref<1x512xf32, #tpu.memory_space<vmem>>, vector<1x512xf32>,
    return
  }
  func.func @transform_0(%arg0: i32) -> (i32, i32) {
    %c0_i32 = arith.constant 0 : i32
    %c0_i32_0 = arith.constant 0 : i32
    return %c0_i32, %arg0 : i32, i32
  }
  func.func @transform_1(%arg0: i32) -> (i32, i32) {
    %c0_i32 = arith.constant 0 : i32
    %c0_i32_0 = arith.constant 0 : i32
    return %c0_i32, %arg0 : i32, i32
  }
  func.func @transform_2(%arg0: i32) -> (i32, i32) {
    %c0_i32 = arith.constant 0 : i32
    %c0_i32_0 = arith.constant 0 : i32
    return %c0_i32, %arg0 : i32, i32
  }
  func.func @transform_3(%arg0: i32) -> (i32, i32) {
    %c0_i32 = arith.constant 0 : i32
    %c0_i32_0 = arith.constant 0 : i32
    return %c0_i32, %arg0 : i32, i32
  }
}

</mosaic_0001>

<bundles_post_ra>
// kernel: tpu_custom_call.1
= control target key start
LH: loop header
LB: loop body
LE: loop exit
PB: predicated region body
PF: predicated region fallthrough
CT: control target
= control target key end

     0   :  { %9 = vsyncpa [#allocation3], 0  ;;  %s1320_s0 = inlined_call_operand.hbm [shape: f32[16,2048], index: 0, kind: input, shape index: {}]   ;;  %s1321_s1 = inlined_call_operand.hbm [shape: s32[1,2048], index: 1, kind: input, shape index: {}]   ;;  %s1322_s2 = inlined_call_operand.hbm [shape: f32[1,2048], index: 2, kind: output, shape index: {0}]   ;;  %s1323_s3 = inlined_call_operand.hbm [shape: f32[1,2048], index: 3, kind: output, shape index: {1}]  }
   0x1   :  { %11 = vsyncpa [#allocation3 + $0x1], 0 }
   0x2   :  { %12 = vsyncpa [#allocation6], 0 }
   0x3   :  { %14 = vsyncpa [#allocation6 + $0x1], 0 }
   0x4   :  { %15 = vsyncpa [#allocation4], 0 }
   0x5   :  { %17 = vsyncpa [#allocation4 + $0x1], 0 }
   0x6   :  { %18 = vsyncpa [#allocation9], 0 }
   0x7   :  { %20 = vsyncpa [#allocation9 + $0x1], 0  ;;  %s973_s12 = smov 0   ;;  %s975_s13 = smov 0  }
   0x8   :  { %s977_s14 = smov 0   ;;  %s979_s15 = smov 0  }
   0x9 LB: > { %s994_s16 = sadd.s32 4294967295, %s942_s15   ;;  %s672_s17 = sadd.s32 4294967294, %s942_s15   ;;  %s942_s15 = sphi %s979_s15, %s1342_s15   ;;  %s938_s14 = sphi %s977_s14, %s1341_s14   ;;  %s934_s13 = sphi %s975_s13, %s1340_s13   ;;  %s930_s12 = sphi %s973_s12, %s1339_s12  }
   0xa   : > { %s998_s18 = sadd.s32 1, %s942_s15   ;;  %s33_s19 = sadd.s32 1, %s938_s14 }
   0xb   : > { %s30_s20 = ssub.s32 %s942_s15, %s998_s18  ;;  %p40_p0 = scmp.ne.s32.totalorder %s938_s14, %s934_s13 }
   0xc   : > { %p31_p1 = scmp.eq.s32.totalorder %s30_s20, 0  ;;  %p41_p2 = scmp.eq.s32.totalorder %s942_s15, 0 }
   0xd   : > { %p46_p3 = scmp.ne.s32.totalorder %s934_s13, %s930_s12  ;;  %p47_p4 = scmp.eq.s32.totalorder %s994_s16, 0 }
   0xe   : > { %s1010_s21 = scalar_select %p31_p1, %s938_s14, %s33_s19  }
   0xf   : > { %p1012_p5 = por %p41_p2, %p40_p0  ;;  %p1016_p6 = por %p47_p4, %p46_p3 }
  0x10   : > { %p96_p7 = scmp.eq.s32.totalorder %s994_s16, 3  ;;  %p102_p8 = scmp.eq.s32.totalorder %s672_s17, 3 }
  0x11   : > { %s1327_s23 = scalar_select %p1016_p6, 1, 0 }
  0x12   : > { %p725_p9 = scmp.lt.s32.totalorder %s942_s15, 4  ;;  %p1022_p10 = por %p96_p7, %p40_p0 }
  0x13   : > { %p1026_p11 = por %p102_p8, %p46_p3  ;;  %s1031_s26 = sand.u32 1, %s938_s14  }
  0x14   : > { %s1328_s24 = scalar_select %p1022_p10, 1, 0 }
  0x15   : > { %s1329_s25 = scalar_select %p1026_p11, 1, 0 }
  0x16   : > { %s699_s27 = sshll.u32 %s942_s15, 9  ;;  %s675_s28 = sshll.u32 %s1031_s26, 6 }
  0x17   : > { %s1038_s4 = scalar_lea.hbm %s1320_s0, %s699_s27  ;;  %s152_s5 = scalar_lea.vmem [#allocation2], %s675_s28 }
  0x18   : > { %s159_s6 = sshll.u32 %s152_s5, 4  ;;  %p1042_p12 = pnand %p725_p9, %p1012_p5  ;;  %s1046_s6 = int_to_ptr.vmem [resolvable:$true] %s159_s6 }
  0x19   : > { %s149_s8 = scalar_lea.sflag [#allocation3], %s1031_s26  ;;  %s788_s9 = scalar_lea.hbm %s1038_s4, 1024 }
  0x1a   : > { %p789_p0 = scmp.ne.s32.totalorder %s1038_s4, %s788_s9  ;;  %p790_p1 = pneg %p1042_p12 }
  0x1b   : > { %s793_s17 = scalar_lea.hbm %s1320_s0, 4096  ;;  %p794_p4 = scmp.lt.s32.totalorder %s1038_s4, %s1320_s0 }
  0x1c   : > { %p791_p2 = pnand %p790_p1, %p789_p0  ;;  %p795_p5 = scmp.lt.s32.totalorder %s793_s17, %s788_s9 }
  0x1e   : > { %p792_p3 = pneg %p791_p2  ;;  %p796_p7 = por %p795_p5, %p794_p4 }
  0x20   : > { %p797_p8 = pnand %p796_p7, %p792_p3 }
  0x22   : > { %800 = shalt.err (!%p797_p8)
}
  0x23   : > { %s801_s22 = scalar_lea.vmem %s1046_s6, 1024  ;;  %s944_s27 = smov [#allocation2]  }
  0x24   : > { %p802_p9 = scmp.ne.s32.totalorder %s1046_s6, %s801_s22  ;;  %s806_s28 = sshll.u32 %s944_s27, 4  ;;  %s807_s28 = int_to_ptr.vmem [resolvable:$false] %s806_s28 }
  0x25   : > { %s808_s29 = scalar_lea.vmem %s807_s28, 2048  ;;  %p809_p13 = scmp.lt.s32.totalorder %s1046_s6, %s807_s28 }
  0x26   : > { %p804_p0 = pnand %p802_p9, %p790_p1  ;;  %p810_p11 = scmp.lt.s32.totalorder %s808_s29, %s801_s22 }
  0x28   : > { %p805_p2 = pneg %p804_p0  ;;  %p811_p10 = por %p810_p11, %p809_p13 }
  0x2a   : > { %p812_p4 = pnand %p811_p10, %p805_p2 }
  0x2c   : > { %815 = shalt.err (!%p812_p4)
}
  0x2d   : > { %s945_s30 = smov 2048   ;;  %s946_s5 = smov 512  }
  0x2e   : > { %s947_s9 = smov 32   ;;  %p186_p3 = scmp.lt.s32.totalorder %s942_s15, 5 }
  0x2f   : > { %714 = dma.hbm_to_vmem [thread:$0]  (!%p1042_p12), %s1038_s4, 1024, %s1046_s6, %s149_s8, %s945_s30, %s946_s5, %s947_s9  }
  0x30   : > { %s678_s10 = sshll.u32 %s1031_s26, 2  ;;  %s700_s11 = sshll.u32 %s942_s15, 6 }
  0x31   : > { %p1331_p10 = scmp.ge.s32.totalorder %s942_s15, 1  ;;  %s1088_s22 = scalar_lea.hbm %s1321_s1, %s700_s11 }
  0x32   : > { %s173_s27 = scalar_lea.vmem [#allocation5], %s678_s10  ;;  %s170_s4 = scalar_lea.sflag [#allocation6], %s1031_s26 }
  0x33   : > { %p1081_p11 = pnand %p1331_p10, %p186_p3  ;;  %s181_s28 = sshll.u32 %s173_s27, 4  ;;  %s182_s28 = int_to_ptr.vmem [resolvable:$true] %s181_s28 }
  0x34   : > { %s816_s6 = scalar_lea.hbm %s1088_s22, 64  ;;  %s821_s30 = scalar_lea.hbm %s1321_s1, 256 }
  0x35   : > { %s1332_s17 = scalar_select %p1081_p11, 1, 0 }
  0x36   : > { %p817_p13 = scmp.ne.s32.totalorder %s1088_s22, %s816_s6  ;;  %p822_p8 = scmp.lt.s32.totalorder %s1088_s22, %s1321_s1 }
  0x37   : > { %p823_p9 = scmp.lt.s32.totalorder %s821_s30, %s816_s6 }
  0x38   : > { %p819_p5 = pnand %p817_p13, %p790_p1 }
  0x39   : > { %p824_p0 = por %p823_p9, %p822_p8 }
  0x3a   : > { %p820_p7 = pneg %p819_p5 }
  0x3c   : > { %p825_p2 = pnand %p824_p0, %p820_p7 }
  0x3e   : > { %828 = shalt.err (!%p825_p2)
}
  0x3f   : > { %s829_s10 = scalar_lea.vmem %s182_s28, 64  ;;  %s948_s26 = smov [#allocation5]  }
  0x40   : > { %p830_p4 = scmp.ne.s32.totalorder %s182_s28, %s829_s10  ;;  %s834_s11 = sshll.u32 %s948_s26, 4  ;;  %s835_s11 = int_to_ptr.vmem [resolvable:$false] %s834_s11 }
  0x41   : > { %s836_s19 = scalar_lea.vmem %s835_s11, 128  ;;  %p837_p13 = scmp.lt.s32.totalorder %s182_s28, %s835_s11 }
  0x42   : > { %p832_p3 = pnand %p830_p4, %p790_p1  ;;  %p838_p5 = scmp.lt.s32.totalorder %s836_s19, %s829_s10 }
  0x44   : > { %p833_p10 = pneg %p832_p3  ;;  %p839_p6 = por %p838_p5, %p837_p13 }
  0x46   : > { %p840_p11 = pnand %p839_p6, %p833_p10 }
  0x48   : > { %843 = shalt.err (!%p840_p11)
}
  0x49   : > { %717 = dma.hbm_to_vmem [thread:$0]  (!%p1042_p12), %s1088_s22, 64, %s182_s28, %s170_s4  }
  0x4a   : > { %p1333_p7 = scmp.ne.s32.totalorder %s1332_s17, 0 }
  0x4b   : > { %s1112_s20 = sand.u32 (!%p1333_p7), 1, %s934_s13   ;;  %p1334_p1 = scmp.ne.s32.totalorder (!%p1333_p7), %s1327_s23, 0 }
  0x4c   : > { %190 = sbr.rel (%p1333_p7) target bundleno = 178 (0xb2), region = 28  ;;  %s682_s27 = sshll.u32 (!%p1333_p7), %s1112_s20, 6 }
  0x4d   : > { %s193_s6 = scalar_lea.sflag (!%p1333_p7), [#allocation3], %s1112_s20  ;;  %s196_s8 = scalar_lea.vmem (!%p1333_p7), [#allocation2], %s682_s27 }
  0x51   : > { %913 = dma.done.wait (%p1334_p1), %s193_s6, 1024  }
  0x52   : > { %915 = vsyncadd (%p1334_p1), %s193_s6, 4294966272  ;;  %s1121_s7 = sshll.u32 %s1112_s20, 2  ;;  %s202_s17 = scalar_lea.sflag [#allocation6], %s1112_s20 }
  0x53   : > { %s205_s22 = scalar_lea.vmem [#allocation5], %s1121_s7 }
  0x54   : > { %917 = dma.done.wait (%p1334_p1), %s202_s17, 64  }
  0x55   : > { %919 = vsyncadd (%p1334_p1), %s202_s17, 4294967232  ;;  %v1129_v0 = vld [vmem:[%s196_s8] sm:$0xff]  ;;  %v1131_v1 = vld [vmem:[%s196_s8 + $0x8] sm:$0xff]  ;;  %v334_v16 = vlaneseq  ;;  %v949_v17 = vmov 1966171168   ;;  %s686_s23 = sshll.u32 %s994_s16, 9 }
  0x56   : > { %v1133_v2 = vld [vmem:[%s196_s8 + $0x10] sm:$0xff]  ;;  %v1135_v3 = vld [vmem:[%s196_s8 + $0x18] sm:$0xff]  ;;  %v1137_v4 = vld [vmem:[%s196_s8 + $0x20] sm:$0xff]  ;;  %v444_v18 = vunpack.c.l.s4 %v949_v17  ;;  %v1158_v32 = vstv %s686_s23  ;;  %s237_s28 = scalar_lea.vmem [#allocation8], %s1121_s7  ;;  %s701_s29 = sshll.u32 %s994_s16, 6 }
  0x57   : > { %v1139_v5 = vld [vmem:[%s196_s8 + $0x28] sm:$0xff]  ;;  %v1141_v6 = vld [vmem:[%s196_s8 + $0x30] sm:$0xff]  ;;  %v1143_v7 = vld [vmem:[%s196_s8 + $0x38] sm:$0xff]  ;;  %v250_v8 = vmax.f32 %v1129_v0, %v1137_v4  ;;  %v420_v23 = vand.u32 127, %v334_v16  ;;  %v1156_v31 = vshrl.u32 %v334_v16, 7  ;;  %s547_s4 = sshll.u32 %s237_s28, 4  ;;  %s1240_s9 = scalar_lea.hbm %s1323_s3, %s701_s29  ;;  %s1232_s4 = int_to_ptr.vmem [resolvable:$true] %s547_s4 }
  0x58   : > { %v257_v9 = vmax.f32 %v1131_v1, %v1139_v5  ;;  %v264_v10 = vmax.f32 %v1133_v2, %v1141_v6  ;;  %v271_v11 = vmax.f32 %v1135_v3, %v1143_v7  ;;  %v445_v28 = vunpack.c.0.s8 %v444_v18  ;;  %s519_s10 = scalar_lea.sflag [#allocation9], %s1112_s20  ;;  %s844_s26 = scalar_lea.vmem %s1232_s4, 64 }
  0x59   : > { %v251_v12 = vrot.slane %v250_v8, 4  ;;  %v421_v35 = vadd.s32 128, %v420_v23  ;;  %v1160_v38 = vadd.s32 256, %v420_v23  ;;  %v423_v39 = vadd.s32 384, %v420_v23  ;;  %p845_p6 = scmp.ne.s32.totalorder %s1232_s4, %s844_s26  ;;  %p1337_p12 = scmp.ne.s32.totalorder %s1328_s24, 0 }
  0x5a   : > { %v258_v13 = vrot.slane %v257_v9, 4  ;;  %v265_v14 = vrot.slane %v264_v10, 4  ;;  %v272_v15 = vrot.slane %v271_v11, 4  ;;  %v1163_v42 = vadd.s32 %v1158_v32, %v420_v23  ;;  %s951_s11 = smov [#allocation8]  }
  0x5b   : > { %v252_v19 = vmax.f32 %v250_v8, %v251_v12  ;;  %v1166_v43 = vsub.s32 %v445_v28, %v1156_v31  ;;  %v336_v46 = vadd.s32 8, %v1156_v31  ;;  %v400_v47 = vsub.s32 0, %v1156_v31  ;;  %p846_p11 = pnand %p845_p6, %p1337_p12  ;;  %s848_s19 = sshll.u32 %s951_s11, 4  ;;  %s849_s19 = int_to_ptr.vmem [resolvable:$false] %s848_s19 }
  0x5c   : > { %v259_v20 = vmax.f32 %v257_v9, %v258_v13  ;;  %v266_v21 = vmax.f32 %v264_v10, %v265_v14  ;;  %v273_v22 = vmax.f32 %v271_v11, %v272_v15  ;;  %v1171_v50 = vadd.s32 %v1158_v32, %v421_v35  ;;  %s850_s27 = scalar_lea.vmem %s849_s19, 128  ;;  %p851_p9 = scmp.lt.s32.totalorder %s1232_s4, %s849_s19 }
  0x5d   : > { %v253_v24 = vrot.slane %v252_v19, 2  ;;  %v404_v51 = vsub.s32 1, %v1156_v31  ;;  %v1198_v18 = vadd.s32 %v1158_v32, %v1160_v38  ;;  %vm429_vm12 = vcmp.lt.s32.totalorder %v1163_v42, 2048  ;;  %p847_p8 = pneg %p846_p11  ;;  %p852_p0 = scmp.lt.s32.totalorder %s850_s27, %s844_s26 }
  0x5e   : > { %v260_v25 = vrot.slane %v259_v20, 2  ;;  %v267_v26 = vrot.slane %v266_v21, 2  ;;  %v274_v27 = vrot.slane %v273_v22, 2 }
  0x5f   : > { %v254_v29 = vmax.f32 %v252_v19, %v253_v24  ;;  %v1201_v19 = vadd.s32 %v1158_v32, %v423_v39  ;;  %v397_v32 = vld [vmem:[%s205_s22] sm:$0xf]  ;;  %p853_p2 = por %p852_p0, %p851_p9 }
  0x60   : > { %v261_v30 = vmax.f32 %v259_v20, %v260_v25  ;;  %v268_v33 = vmax.f32 %v266_v21, %v267_v26  ;;  %v275_v34 = vmax.f32 %v273_v22, %v274_v27  ;;  %v408_v22 = vsub.s32 2, %v1156_v31 }
  0x61   : > { %v255_v36 = vrot.slane %v254_v29, 1  ;;  %p854_p4 = pnand %p853_p2, %p847_p8 }
  0x62   : > { %v262_v37 = vrot.slane %v261_v30, 1  ;;  %v269_v40 = vrot.slane %v268_v33, 1  ;;  %v276_v41 = vrot.slane %v275_v34, 1 }
  0x63   : > { %v256_v44 = vmax.f32 %v254_v29, %v255_v36  ;;  %v412_v29 = vsub.s32 3, %v1156_v31 }
  0x64   : > { %v263_v45 = vmax.f32 %v261_v30, %v262_v37  ;;  %v270_v48 = vmax.f32 %v268_v33, %v269_v40  ;;  %v277_v49 = vmax.f32 %v275_v34, %v276_v41 }
  0x65   : > { %v278_v52 = vsub.f32 %v1129_v0, %v256_v44  ;;  %v282_v54 = vsub.f32 %v1137_v4, %v256_v44  ;;  %vm337_vm0 = vcmp.eq.f32.partialorder %v1129_v0, %v256_v44  ;;  %vm341_vm4 = vcmp.eq.f32.partialorder %v1137_v4, %v256_v44 }
  0x66   : > { %v279_v53 = vsub.f32 %v1131_v1, %v263_v45  ;;  %v283_v55 = vsub.f32 %v1139_v5, %v263_v45  ;;  %v280_v56 = vsub.f32 %v1133_v2, %v270_v48  ;;  %v281_v57 = vsub.f32 %v1135_v3, %v277_v49 }
  0x67   : > { %v284_v58 = vsub.f32 %v1141_v6, %v270_v48  ;;  %v285_v59 = vsub.f32 %v1143_v7, %v277_v49  ;;  %v286_v60 = vmul.f32 1.442695, %v278_v52  ;;  %v294_v62 = vmul.f32 1.442695, %v282_v54 }
  0x68   : > { %v288_v61 = vmul.f32 1.442695, %v279_v53  ;;  %v290_v63 = vmul.f32 1.442695, %v280_v56  ;;  %v292_v8 = vmul.f32 1.442695, %v281_v57  ;;  %vm338_vm1 = vcmp.eq.f32.partialorder %v1131_v1, %v263_v45 }
  0x69   : > { %v296_v9 = vmul.f32 1.442695, %v283_v55  ;;  %764 = vpow2.f32 %v286_v60  ;;  %v298_v10 = vmul.f32 1.442695, %v284_v58  ;;  %v300_v11 = vmul.f32 1.442695, %v285_v59 }
  0x6a   : > { %vm339_vm2 = vcmp.eq.f32.partialorder %v1133_v2, %v270_v48  ;;  %766 = vpow2.f32 %v288_v61  ;;  %vm340_vm3 = vcmp.eq.f32.partialorder %v1135_v3, %v277_v49  ;;  %vm342_vm5 = vcmp.eq.f32.partialorder %v1139_v5, %v263_v45 }
  0x6b   : > { %768 = vpow2.f32 %v290_v63  ;;  %vm343_vm6 = vcmp.eq.f32.partialorder %v1141_v6, %v270_v48  ;;  %vm344_vm7 = vcmp.eq.f32.partialorder %v1143_v7, %v277_v49  ;;  %v345_v1 = vsel %vm337_vm0, %v1156_v31, 16 }
  0x6c   : > { %770 = vpow2.f32 %v292_v8  ;;  %v346_v12 = vsel %vm338_vm1, %v1156_v31, 16  ;;  %v347_v2 = vsel %vm339_vm2, %v1156_v31, 16  ;;  %v348_v3 = vsel %vm340_vm3, %v1156_v31, 16 }
  0x6d   : > { %772 = vpow2.f32 %v294_v62  ;;  %v349_v4 = vsel %vm341_vm4, %v336_v46, 16  ;;  %v350_v13 = vsel %vm342_vm5, %v336_v46, 16  ;;  %v351_v5 = vsel %vm343_vm6, %v336_v46, 16 }
  0x6e   : > { %774 = vpow2.f32 %v296_v9  ;;  %v352_v14 = vsel %vm344_vm7, %v336_v46, 16  ;;  %vm353_vm8 = vcmp.lt.s32.totalorder %v345_v1, %v349_v4  ;;  %vm364_vm9 = vcmp.lt.s32.totalorder %v346_v12, %v350_v13 }
  0x6f   : > { %776 = vpow2.f32 %v298_v10  ;;  %v354_v6 = vsel %vm353_vm8, %v345_v1, %v349_v4  ;;  %v365_v7 = vsel %vm364_vm9, %v346_v12, %v350_v13  ;;  %vm375_vm10 = vcmp.lt.s32.totalorder %v347_v2, %v351_v5 }
  0x70   : > { %778 = vpow2.f32 %v300_v11  ;;  %v355_v0 = vrot.slane %v354_v6, 4  ;;  %v366_v15 = vrot.slane %v365_v7, 4  ;;  %v376_v17 = vsel %vm375_vm10, %v347_v2, %v351_v5 }
  0x71   : > { %v377_v20 = vrot.slane %v376_v17, 4  ;;  %vm386_vm11 = vcmp.lt.s32.totalorder %v348_v3, %v352_v14  ;;  %vm430_vm0 = vcmp.lt.s32.totalorder %v1171_v50, 2048  ;;  %vm431_vm1 = vcmp.lt.s32.totalorder %v1198_v18, 2048 }
  0x72   : > { %vm356_vm13 = vcmp.lt.s32.totalorder %v354_v6, %v355_v0  ;;  %vm367_vm14 = vcmp.lt.s32.totalorder %v365_v7, %v366_v15  ;;  %v387_v21 = vsel %vm386_vm11, %v348_v3, %v352_v14  ;;  %vm432_vm3 = vcmp.lt.s32.totalorder %v1201_v19, 2048 }
  0x73   : > { %v357_v23 = vsel %vm356_vm13, %v354_v6, %v355_v0  ;;  %v368_v24 = vsel %vm367_vm14, %v365_v7, %v366_v15  ;;  %vm378_vm15 = vcmp.lt.s32.totalorder %v376_v17, %v377_v20  ;;  %v388_v25 = vrot.slane %v387_v21, 4 }
  0x74   : > { %v358_v26 = vrot.slane %v357_v23, 2  ;;  %v369_v27 = vrot.slane %v368_v24, 2  ;;  %v379_v28 = vsel %vm378_vm15, %v376_v17, %v377_v20  ;;  %v401_v45 = vrot.slane %v397_v32, %v400_v47 }
  0x75   : > { %v380_v30 = vrot.slane %v379_v28, 2  ;;  %vm389_vm2 = vcmp.lt.s32.totalorder %v387_v21, %v388_v25  ;;  %v405_v49 = vrot.slane %v397_v32, %v404_v51  ;;  %v409_v52 = vrot.slane %v397_v32, %v408_v22 }
  0x76   : > { %v765_v33 = vpop.eup %764  ;;  %vm359_vm4 = vcmp.lt.s32.totalorder %v357_v23, %v358_v26  ;;  %vm370_vm5 = vcmp.lt.s32.totalorder %v368_v24, %v369_v27  ;;  %v390_v34 = vsel %vm389_vm2, %v387_v21, %v388_v25  ;;  %v413_v55 = vrot.slane %v397_v32, %v412_v29 }
  0x77   : > { %v767_v35 = vpop.eup %766  ;;  %v360_v36 = vsel %vm359_vm4, %v357_v23, %v358_v26  ;;  %v371_v37 = vsel %vm370_vm5, %v368_v24, %v369_v27  ;;  %vm381_vm6 = vcmp.lt.s32.totalorder %v379_v28, %v380_v30  ;;  %v391_v38 = vrot.slane %v390_v34, 2 }
  0x78   : > { %v769_v39 = vpop.eup %768  ;;  %v361_v40 = vrot.slane %v360_v36, 1  ;;  %v372_v41 = vrot.slane %v371_v37, 1  ;;  %v382_v44 = vsel %vm381_vm6, %v379_v28, %v380_v30  ;;  %v950_v10 = vmov 0.0  }
  0x79   : > { %v771_v46 = vpop.eup %770  ;;  %v383_v48 = vrot.slane %v382_v44, 1  ;;  %vm392_vm7 = vcmp.lt.s32.totalorder %v390_v34, %v391_v38 }
  0x7a   : > { %v773_v53 = vpop.eup %772  ;;  %vm362_vm8 = vcmp.lt.s32.totalorder %v360_v36, %v361_v40  ;;  %vm373_vm9 = vcmp.lt.s32.totalorder %v371_v37, %v372_v41  ;;  %v393_v54 = vsel %vm392_vm7, %v390_v34, %v391_v38 }
  0x7b   : > { %v775_v56 = vpop.eup %774  ;;  %v302_v57 = vadd.f32 %v773_v53, %v765_v33  ;;  %v363_v58 = vsel %vm362_vm8, %v360_v36, %v361_v40  ;;  %v374_v59 = vsel %vm373_vm9, %v371_v37, %v372_v41  ;;  %vm384_vm10 = vcmp.lt.s32.totalorder %v382_v44, %v383_v48 }
  0x7c   : > { %v777_v60 = vpop.eup %776  ;;  %v309_v61 = vadd.f32 %v775_v56, %v767_v35  ;;  %v385_v47 = vsel %vm384_vm10, %v382_v44, %v383_v48  ;;  %v394_v62 = vrot.slane %v393_v54, 1  ;;  %vm414_vm11 = vcmp.eq.s32.totalorder %v363_v58, %v401_v45 }
  0x7d   : > { %v779_v63 = vpop.eup %778  ;;  %v303_v8 = vrot.slane %v302_v57, 4  ;;  %v316_v31 = vadd.f32 %v777_v60, %v769_v39  ;;  %vm415_vm13 = vcmp.eq.s32.totalorder %v374_v59, %v405_v49  ;;  %vm416_vm14 = vcmp.eq.s32.totalorder %v385_v47, %v409_v52  ;;  %vm471_vm15 = vmand %vm429_vm12, %vm414_vm11 }
  0x7e   : > { %v310_v51 = vrot.slane %v309_v61, 4  ;;  %v323_v9 = vadd.f32 %v779_v63, %v771_v46  ;;  %vm395_vm2 = vcmp.lt.s32.totalorder %v393_v54, %v394_v62  ;;  %vm472_vm4 = vmand %vm430_vm0, %vm415_vm13  ;;  %v687_v11 = vsel %vm471_vm15, 1.0, %v950_v10 }
  0x7f   : > { %v304_v1 = vadd.f32 %v303_v8, %v302_v57  ;;  %v317_v12 = vrot.slane %v316_v31, 4  ;;  %v396_v2 = vsel %vm395_vm2, %v393_v54, %v394_v62  ;;  %vm473_vm5 = vmand %vm431_vm1, %vm416_vm14  ;;  %v688_v3 = vsel %vm472_vm4, 1.0, %v950_v10 }
  0x80   : > { %v311_v4 = vadd.f32 %v310_v51, %v309_v61  ;;  %v324_v13 = vrot.slane %v323_v9, 4  ;;  %vm417_vm6 = vcmp.eq.s32.totalorder %v396_v2, %v413_v55  ;;  %v689_v5 = vsel %vm473_vm5, 1.0, %v950_v10 }
  0x81   : > { %v305_v14 = vrot.slane %v304_v1, 2  ;;  %v318_v6 = vadd.f32 %v317_v12, %v316_v31  ;;  %vm474_vm7 = vmand %vm432_vm3, %vm417_vm6  ;;  %v487_v7 = vcombine.low %v687_v11, %v688_v3  ;;  %vm1228_vm8 = vcmp.lt.s32.totalorder %v334_v16, 512 }
  0x82   : > { %v312_v0 = vrot.slane %v311_v4, 2  ;;  %v325_v15 = vadd.f32 %v324_v13, %v323_v9  ;;  %v690_v17 = vsel %vm474_vm7, 1.0, %v950_v10 }
  0x83   : > { %v306_v20 = vadd.f32 %v305_v14, %v304_v1  ;;  %v319_v21 = vrot.slane %v318_v6, 2  ;;  %v488_v22 = vcombine.low %v689_v5, %v690_v17  ;;  %v495_v23 = vrot.slane %v487_v7, %v1166_v43 }
  0x84   : > { %v313_v24 = vadd.f32 %v312_v0, %v311_v4  ;;  %v326_v25 = vrot.slane %v325_v15, 2 }
  0x85   : > { %v307_v26 = vrot.slane %v306_v20, 1  ;;  %v320_v27 = vadd.f32 %v319_v21, %v318_v6  ;;  %v502_v28 = vrot.slane %v488_v22, %v1166_v43 }
  0x86   : > { %v314_v29 = vrot.slane %v313_v24, 1  ;;  %v327_v30 = vadd.f32 %v326_v25, %v325_v15 }
  0x87   : > { %v308_v32 = vadd.f32 %v307_v26, %v306_v20  ;;  %v321_v33 = vrot.slane %v320_v27, 1  ;;  %v503_v34 = vcombine.low %v495_v23, %v502_v28 }
  0x88   : > { %v315_v35 = vadd.f32 %v314_v29, %v313_v24  ;;  %v328_v36 = vrot.slane %v327_v30, 1 }
  0x89   : > { %v322_v38 = vadd.f32 %v321_v33, %v320_v27  ;;  %780 = vrcp.f32 %v308_v32  ;;  %v510_v39 = vrot.slane %v503_v34, %v1166_v43 }
  0x8a   : > { %v329_v40 = vadd.f32 %v328_v36, %v327_v30  ;;  %782 = vrcp.f32 %v315_v35 }
  0x8b   : > { %784 = vrcp.f32 %v322_v38  ;;  %512 = vst.msk [vmem:[%s237_s28] sm:$0xf] %vm1228_vm8, %v510_v39 }
  0x8c   : > { %786 = vrcp.f32 %v329_v40 }
  0x8d   : > { %857 = shalt.err (!%p854_p4)
}
  0x8e   : > { %s858_s6 = scalar_lea.hbm %s1240_s9, 64  ;;  %s862_s22 = scalar_lea.hbm %s1323_s3, 256 }
  0x8f   : > { %p859_p3 = scmp.ne.s32.totalorder %s1240_s9, %s858_s6  ;;  %p863_p5 = scmp.lt.s32.totalorder %s1240_s9, %s1323_s3 }
  0x90   : > { %p864_p7 = scmp.lt.s32.totalorder %s862_s22, %s858_s6 }
  0x91   : > { %p860_p10 = pnand %p859_p3, %p1337_p12 }
  0x92   : > { %p865_p1 = por %p864_p7, %p863_p5 }
  0x93   : > { %p861_p13 = pneg %p860_p10 }
  0x95   : > { %p866_p6 = pnand %p865_p1, %p861_p13 }
  0x97   : > { %869 = shalt.err (!%p866_p6)
}
  0x98   : > { %708 = dma.vmem_to_hbm [thread:$0]  (%p1337_p12), %s1232_s4, 64, %s1240_s9, %s519_s10   ;;  %v781_v16 = vpop.eup %780 }
  0x99   : > { %v783_v41 = vpop.eup %782  ;;  %v433_v44 = vsel %vm429_vm12, %v781_v16, 2.0  ;;  %s230_s4 = scalar_lea.vmem [#allocation7], %s1121_s7  ;;  %s531_s10 = scalar_lea.hbm %s1322_s2, %s701_s29 }
  0x9a   : > { %v785_v45 = vpop.eup %784  ;;  %v434_v46 = vsel %vm430_vm0, %v783_v41, 2.0  ;;  %s533_s30 = sshll.u32 %s230_s4, 4  ;;  %s514_s26 = scalar_lea.sflag [#allocation4], %s1112_s20  ;;  %s1276_s30 = int_to_ptr.vmem [resolvable:$true] %s533_s30 }
  0x9b   : > { %v787_v48 = vpop.eup %786  ;;  %v435_v49 = vsel %vm431_vm1, %v785_v45, 2.0  ;;  %v441_v52 = vcombine.low %v433_v44, %v434_v46  ;;  %s870_s11 = scalar_lea.vmem %s1276_s30, 64  ;;  %s952_s7 = smov [#allocation7]  }
  0x9c   : > { %v436_v53 = vsel %vm432_vm3, %v787_v48, 2.0  ;;  %p871_p11 = scmp.ne.s32.totalorder %s1276_s30, %s870_s11  ;;  %s874_s19 = sshll.u32 %s952_s7, 4  ;;  %s875_s19 = int_to_ptr.vmem [resolvable:$false] %s874_s19 }
  0x9d   : > { %v442_v54 = vcombine.low %v435_v49, %v436_v53  ;;  %v449_v55 = vrot.slane %v441_v52, %v1166_v43  ;;  %s876_s27 = scalar_lea.vmem %s875_s19, 128  ;;  %p877_p0 = scmp.lt.s32.totalorder %s1276_s30, %s875_s19 }
  0x9e   : > { %p872_p8 = pnand %p871_p11, %p1337_p12  ;;  %p878_p2 = scmp.lt.s32.totalorder %s876_s27, %s870_s11 }
  0x9f   : > { %v456_v42 = vrot.slane %v442_v54, %v1166_v43 }
  0xa0   : > { %p873_p9 = pneg %p872_p8  ;;  %p879_p4 = por %p878_p2, %p877_p0 }
  0xa1   : > { %v457_v56 = vcombine.low %v449_v55, %v456_v42 }
  0xa2   : > { %p880_p3 = pnand %p879_p4, %p873_p9 }
  0xa3   : > { %v464_v50 = vrot.slane %v457_v56, %v1166_v43 }
  0xa5   : > { %470 = vst.msk [vmem:[%s230_s4] sm:$0xf] %vm1228_vm8, %v464_v50 }
  0xa6   : > { %883 = shalt.err (!%p880_p3)
}
  0xa7   : > { %s884_s16 = scalar_lea.hbm %s531_s10, 64  ;;  %s888_s6 = scalar_lea.hbm %s1322_s2, 256 }
  0xa8   : > { %p885_p10 = scmp.ne.s32.totalorder %s531_s10, %s884_s16  ;;  %p889_p7 = scmp.lt.s32.totalorder %s531_s10, %s1322_s2 }
  0xa9   : > { %p890_p1 = scmp.lt.s32.totalorder %s888_s6, %s884_s16 }
  0xaa   : > { %p886_p13 = pnand %p885_p10, %p1337_p12 }
  0xab   : > { %p891_p6 = por %p890_p1, %p889_p7 }
  0xac   : > { %p887_p5 = pneg %p886_p13 }
  0xae   : > { %p892_p11 = pnand %p891_p6, %p887_p5 }
  0xb0   : > { %895 = shalt.err (!%p892_p11)
}
  0xb1   : > { %707 = dma.vmem_to_hbm [thread:$0]  (%p1337_p12), %s1276_s30, 64, %s531_s10, %s514_s26  }
  0xb2 PF: > { %p726_p8 = scmp.ge.s32.totalorder %s942_s15, 2  ;;  %s559_s22 = sand.u32 1, %s930_s12  }
  0xb3   : > { %p1338_p9 = scmp.ne.s32.totalorder %s1329_s25, 0  ;;  %s560_s23 = scalar_lea.sflag [#allocation4], %s559_s22 }
  0xb5   : > { %p719_p0 = pnand %p726_p8, %p1338_p9 }
  0xb7   : > { %p720_p2 = pneg %p719_p0 }
  0xb9   : > { %921 = dma.done.wait (%p720_p2), %s560_s23, 64  }
  0xba   : > { %923 = vsyncadd (%p720_p2), %s560_s23, 4294967232  ;;  %s569_s28 = scalar_lea.sflag [#allocation9], %s559_s22 }
  0xbb   : > { %925 = dma.done.wait (%p720_p2), %s569_s28, 64  }
  0xbc   : > { %927 = vsyncadd (%p720_p2), %s569_s28, 4294967232  ;;  %p23_p12 = scmp.ge.s32.totalorder %s998_s18, 6   ;;  %s1339_s12 = smov %s934_s13 }
  0xbd   : > { %s1340_s13 = smov %s938_s14  ;;  %s1341_s14 = smov %s1010_s21 }
  0xbe   : > { %s1342_s15 = smov %s998_s18  ;;  %25 = sbr.rel (!%p23_p12) target bundleno = 9 (0x9), region = 103 }
  0xc3   :  { %574 = vsyncpa [#allocation3], 1 }
  0xc4   :  { %576 = vsyncpa [#allocation3 + $0x1], 1 }
  0xc5   :  { %577 = vsyncpa [#allocation6], 1 }
  0xc6   :  { %579 = vsyncpa [#allocation6 + $0x1], 1 }
  0xc7   :  { %580 = vsyncpa [#allocation4], 1 }
  0xc8   :  { %582 = vsyncpa [#allocation4 + $0x1], 1 }
  0xc9   :  { %583 = vsyncpa [#allocation9], 1 }
  0xca   :  { %585 = vsyncpa [#allocation9 + $0x1], 1 }

</bundles_post_ra>
